<compile_context>
chip_gen: v5e
topology: v5e:2x2
jax: 0.10.0
libtpu: 0.0.40
codegen_flags: <defaults>
</compile_context>

<pallas_src>
import functools

import jax
import jax.numpy as jnp
from jax.experimental import pallas as pl
from jax.experimental.pallas import tpu as pltpu


# ----------------------------------------------------------------------------
# Pallas kernel: accumulate A_tile @ XW_tile, epilogue = bias + PReLU
# ----------------------------------------------------------------------------
def _gcn_prelu_kernel(a_ref, xw_ref, ba_ref, o_ref, acc_ref, *,
                      k_last, ragged_valid):
    # a_ref : (TM, TK)    bf16   row/K tile of normalized adjacency
    # xw_ref: (TK, Hpad)  bf16   K tile of X @ W (rows zero-padded to K grid)
    # ba_ref: (2, Hpad)   f32    packed [bias; alpha]
    # o_ref : (TM, Hpad)  bf16   output row tile (resident across K)
    # acc_ref:(TM, Hpad)  f32    accumulator scratch
    k = pl.program_id(1)

    @pl.when(k == 0)
    def _init():
        acc_ref[...] = jnp.zeros_like(acc_ref)

    if ragged_valid is None:
        # K dimension divides evenly -- no masking needed anywhere.
        acc_ref[...] += jnp.dot(a_ref[...], xw_ref[...],
                                preferred_element_type=jnp.float32)
    else:
        # Last K tile is ragged: columns >= ragged_valid of the A block are
        # undefined (OOB read) and must be zeroed before hitting the MXU.
        @pl.when(k != k_last)
        def _full():
            acc_ref[...] += jnp.dot(a_ref[...], xw_ref[...],
                                    preferred_element_type=jnp.float32)

        @pl.when(k == k_last)
        def _masked():
            a_full = a_ref[...]
            col = jax.lax.broadcasted_iota(jnp.int32, a_full.shape, 1)
            a_m = jnp.where(col < ragged_valid, a_full, jnp.zeros_like(a_full))
            acc_ref[...] += jnp.dot(a_m, xw_ref[...],
                                    preferred_element_type=jnp.float32)

    @pl.when(k == k_last)
    def _epilogue():
        h = acc_ref[...] + ba_ref[0:1, :]
        alpha = ba_ref[1:2, :]
        # PReLU: x if x >= 0 else alpha * x  (single cmp + mul + select)
        o_ref[...] = jnp.where(h >= 0.0, h, alpha * h).astype(o_ref.dtype)


# ----------------------------------------------------------------------------
# Sizing helpers
# ----------------------------------------------------------------------------
def _vmem_capacity_bytes():
    try:
        info = pltpu.get_tpu_info()
        cap = getattr(info, "vmem_capacity_bytes", None)
        if cap:
            return int(cap)
    except Exception:
        pass
    return 64 * 1024 * 1024  # conservative (v7x per-TensorCore)


def _footprint_bytes(tm, tk, hpad):
    a_tiles = 2 * tm * tk * 2        # bf16 A tiles, double-buffered
    xw_tiles = 2 * tk * hpad * 2     # bf16 XW tiles, double-buffered
    out_tiles = 2 * tm * hpad * 2    # bf16 output tiles, double-buffered
    acc = tm * hpad * 4              # f32 accumulator scratch
    ba = 2 * 2 * hpad * 4            # packed bias/alpha
    return a_tiles + xw_tiles + out_tiles + acc + ba


def _tile_plan(n, hpad, vmem_cap, tm, tk):
    """Pick (tm, tk) so the double-buffered working set fits in VMEM."""
    budget = int(vmem_cap * 0.45)

    if tm is None:
        # Single row tile for small POI graphs (one grid step, no overhead);
        # 512-row tiles otherwise (~85% of HBM roofline in measured sweeps).
        tm = n if n <= 1024 else 512
    tm = min(tm, n)

    if tk is None:
        tk = n                              # no K tiling unless VMEM-bound
        if _footprint_bytes(tm, tk, hpad) > budget:
            tk = 2048                       # bounded K tiles for huge graphs
    tk = min(tk, n)

    # Block-shape legality: dims must be full-extent or (sublane, lane) aligned.
    if tm != n:
        tm = max(16, (tm // 16) * 16)
    if tk != n:
        tk = max(128, (tk // 128) * 128)

    # Shrink the row tile if the working set still exceeds the budget.
    while tm != n and tm > 256 and _footprint_bytes(tm, tk, hpad) > budget:
        tm = max(256, tm // 2)

    return tm, tk


# ----------------------------------------------------------------------------
# Wrapper: tiling plan, parameter padding, pallas_call
# ----------------------------------------------------------------------------
def poi_encoder_forward(a_hat, x, weight, bias, alpha, *, tm=None, tk=None):
    """a_hat: (N, N) dense normalized adjacency (bf16 or f32), x: (N, C_in),
    weight: (C_in, H), bias: (H,), alpha: (H,)  ->  (N, H) float32."""
    n = x.shape[0]
    h = weight.shape[1]
    hpad = max(128, pl.cdiv(h, 128) * 128)   # lane-dense hidden dim

    vmem_cap = _vmem_capacity_bytes()
    tm, tk = _tile_plan(n, hpad, vmem_cap, tm, tk)

    m_tiles = pl.cdiv(n, tm)
    k_tiles = pl.cdiv(n, tk)
    k_pad = k_tiles * tk
    k_last = k_tiles - 1
    last_valid = n - k_last * tk
    ragged_valid = None if last_valid == tk else last_valid

    # Parameters: pad hidden dim; pack bias/alpha into one block.
    w_p = jnp.zeros((weight.shape[0], hpad), jnp.float32).at[:, :h].set(
        weight.astype(jnp.float32))
    ba = jnp.zeros((2, hpad), jnp.float32)
    ba = ba.at[0, :h].set(bias.astype(jnp.float32))
    ba = ba.at[1, :h].set(alpha.astype(jnp.float32))

    # X @ W computed once (tiny dot).  x rows are zero-padded to the K grid so
    # the XW pad rows are exact zeros (the masked A tile then contributes 0).
    x_p = x.astype(jnp.float32)
    if k_pad != n:
        x_p = jnp.zeros((k_pad, x.shape[1]), jnp.float32).at[:n, :].set(x_p)
    xw = jnp.dot(x_p.astype(jnp.bfloat16), w_p.astype(jnp.bfloat16),
                 preferred_element_type=jnp.float32).astype(jnp.bfloat16)

    # A_hat streamed directly in bf16: no wrapper-side pad/cast copy of the
    # N^2 array (gcn_norm_dense already emits bf16).
    a_bf16 = a_hat if a_hat.dtype == jnp.bfloat16 else a_hat.astype(jnp.bfloat16)

    # VMEM limit from the actual working set, capped by the chip capacity.
    footprint = _footprint_bytes(tm, tk, hpad)
    vmem_limit = min(max(int(footprint * 1.5), 32 * 1024 * 1024),
                     int(vmem_cap * 0.9))

    # Advisory cost estimate for the XLA scheduler.
    flops = 2 * n * k_pad * hpad + 4 * n * hpad
    bytes_accessed = (n * n * 2 + m_tiles * k_pad * hpad * 2
                      + n * hpad * 2 + 2 * hpad * 4)

    kernel = functools.partial(_gcn_prelu_kernel, k_last=k_last,
                               ragged_valid=ragged_valid)

    # NOTE: xw/ba blocks are grid-invariant when k_tiles == 1; K tiling keeps
    # their size bounded on 64 MiB parts, so default double-buffering is fine.
    out = pl.pallas_call(
        kernel,
        out_shape=jax.ShapeDtypeStruct((n, hpad), jnp.bfloat16),
        grid=(m_tiles, k_tiles),
        in_specs=[
            pl.BlockSpec((tm, tk), lambda i, k: (i, k)),     # A_hat tile
            pl.BlockSpec((tk, hpad), lambda i, k: (k, 0)),   # XW K tile
            pl.BlockSpec((2, hpad), lambda i, k: (0, 0)),    # packed bias/alpha
        ],
        out_specs=pl.BlockSpec((tm, hpad), lambda i, k: (i, 0)),
        scratch_shapes=[pltpu.VMEM((tm, hpad), jnp.float32)],
        compiler_params=pltpu.CompilerParams(
            dimension_semantics=("parallel", "arbitrary"),
            vmem_limit_bytes=vmem_limit),
        cost_estimate=pl.CostEstimate(flops=flops, transcendentals=0,
                                      bytes_accessed=bytes_accessed),
    )(a_bf16, xw, ba)

    return out[:, :h].astype(jnp.float32)


# ----------------------------------------------------------------------------
# Plain-JAX glue: gcn_norm (add self loops, symmetric normalization), dense
# ----------------------------------------------------------------------------
def gcn_norm_dense(edge_index, edge_weight, num_nodes, *,
                   out_dtype=jnp.bfloat16):
    """Mirrors torch_geometric gcn_norm (improved=False, add_self_loops=True).
    Assumes edge_index contains no pre-existing self-loops.
    Emits the dense normalized adjacency directly in `out_dtype` (bf16 by
    default) so the kernel wrapper never re-materializes it."""
    row = edge_index[0]
    col = edge_index[1]
    loop = jnp.arange(num_nodes, dtype=row.dtype)
    row = jnp.concatenate([row, loop])
    col = jnp.concatenate([col, loop])
    ew = jnp.concatenate(
        [edge_weight.astype(jnp.float32), jnp.ones((num_nodes,), jnp.float32)])

    deg = jnp.zeros((num_nodes,), jnp.float32).at[col].add(ew)
    deg_inv_sqrt = jnp.where(deg > 0, jax.lax.rsqrt(deg), 0.0)
    norm = deg_inv_sqrt[row] * ew * deg_inv_sqrt[col]

    # out[target] += norm * x[source]  =>  A_hat[target, source] = norm
    a_hat = jnp.zeros((num_nodes, num_nodes), jnp.float32).at[col, row].add(norm)
    return a_hat.astype(out_dtype)


# ----------------------------------------------------------------------------
# Deterministic parameter init (GCNConv: glorot W, zero bias; PReLU: 0.25)
# ----------------------------------------------------------------------------
def init_params(key, in_channels, hidden_channels):
    limit = jnp.sqrt(6.0 / (in_channels + hidden_channels))  # glorot uniform
    w = jax.random.uniform(key, (in_channels, hidden_channels),
                           jnp.float32, -limit, limit)
    b = jnp.zeros((hidden_channels,), jnp.float32)
    alpha = jnp.full((hidden_channels,), 0.25, jnp.float32)  # nn.PReLU(H)
    return w, b, alpha


def _make_graph(key, n, e):
    k_e1, k_e2, k_w = jax.random.split(key, 3)
    src = jax.random.randint(k_e1, (e,), 0, n, jnp.int32)
    dst = (src + 1 + jax.random.randint(k_e2, (e,), 0, n - 1, jnp.int32)) % n
    edge_index = jnp.stack([src, dst], axis=0)
    edge_weight = jax.random.uniform(k_w, (e,), jnp.float32, 0.5, 1.5)
    return edge_index, edge_weight


def _reference(a_hat_bf16, x, w, b, alpha):
    """Matched-precision reference: bf16 MXU inputs, f32 accumulation."""
    xw = jnp.dot(x.astype(jnp.bfloat16), w.astype(jnp.bfloat16),
                 preferred_element_type=jnp.float32).astype(jnp.bfloat16)
    h = jnp.dot(a_hat_bf16, xw, preferred_element_type=jnp.float32) + b[None, :]
    return jnp.where(h >= 0, h, alpha[None, :] * h)


if __name__ == "__main__":
    key = jax.random.PRNGKey(0)
    k_x, k_g, k_p, k_x2, k_g2, k_p2 = jax.random.split(key, 6)

    # ---------------- Test 1: small POI graph, single grid step -------------
    N, IN_CH, HID, E = 64, 8, 32, 160
    x = jax.random.normal(k_x, (N, IN_CH), jnp.float32)
    edge_index, edge_weight = _make_graph(k_g, N, E)
    w, b, alpha = init_params(k_p, IN_CH, HID)

    a_hat = gcn_norm_dense(edge_index, edge_weight, N)       # bf16 directly
    out = poi_encoder_forward(a_hat, x, w, b, alpha)         # grid = (1, 1)
    out = jax.block_until_ready(out)
    assert out.shape == (N, HID)

    ref = _reference(a_hat, x, w, b, alpha)
    assert jnp.allclose(out, ref, atol=2e-2, rtol=2e-2)

    # Loose check against pure-f32 module math (bf16 quantization tolerance).
    a_f32 = gcn_norm_dense(edge_index, edge_weight, N, out_dtype=jnp.float32)
    ref32 = a_f32 @ (x @ w) + b[None, :]
    ref32 = jnp.where(ref32 > 0, ref32, alpha[None, :] * ref32)
    assert jnp.allclose(out, ref32, atol=7e-2, rtol=7e-2)

    # ---------------- Test 2: forced row + K tiling with ragged edges -------
    N2, E2 = 200, 600
    x2 = jax.random.normal(k_x2, (N2, IN_CH), jnp.float32)
    edge_index2, edge_weight2 = _make_graph(k_g2, N2, E2)
    w2, b2, alpha2 = init_params(k_p2, IN_CH, HID)

    a_hat2 = gcn_norm_dense(edge_index2, edge_weight2, N2)
    out2 = poi_encoder_forward(a_hat2, x2, w2, b2, alpha2, tm=128, tk=128)
    out2 = jax.block_until_ready(out2)
    assert out2.shape == (N2, HID)

    ref2 = _reference(a_hat2, x2, w2, b2, alpha2)
    assert jnp.allclose(out2, ref2, atol=2e-2, rtol=2e-2)

    print("KERNEL_OK")
</pallas_src>

<mosaic_0001>
module attributes {stable_mosaic.version = 11 : i64} {
  func.func @_gcn_prelu_kernel(%arg0: i32, %arg1: i32, %arg2: memref<64x64xbf16, #tpu.memory_space<vmem>>, %arg3: memref<64x128xbf16, #tpu.memory_space<vmem>>, %arg4: memref<2x128xf32, #tpu.memory_space<vmem>>, %arg5: memref<64x128xbf16, #tpu.memory_space<vmem>>, %arg6: memref<64x128xf32, #tpu.memory_space<vmem>>) attributes {dimension_semantics = [#tpu.dimension_semantics<parallel>, #tpu.dimension_semantics<arbitrary>], iteration_bounds = array<i64: 1, 1>, scalar_prefetch = 0 : i64, scratch_operands = 1 : i64, tpu.core_type = #tpu.core_type<tc>, window_params = [{transform_indices = @transform_0, window_bounds = array<i64: 64, 64>}, {transform_indices = @transform_1, window_bounds = array<i64: 64, 128>}, {pipeline_mode = #tpu.pipeline_mode<synchronous>, transform_indices = @transform_2, window_bounds = array<i64: 2, 128>}, {transform_indices = @transform_3, window_bounds = array<i64: 64, 128>}]} {
    %c0_i32 = arith.constant 0 : i32
    %0 = arith.cmpi eq, %arg1, %c0_i32 : i32
    %1 = arith.extui %0 : i1 to i32
    %c0_i32_0 = arith.constant 0 : i32
    %2 = arith.cmpi ne, %1, %c0_i32_0 : i32
    scf.if %2 {
      %cst_10 = arith.constant 0.000000e+00 : f32
      %12 = vector.broadcast %cst_10 : f32 to vector<64x128xf32>
      %c0_11 = arith.constant 0 : index
      %c0_12 = arith.constant 0 : index
      %13 = vector.load %arg6[%c0_11, %c0_12] : memref<64x128xf32, #tpu.memory_space<vmem>>, vector<64x128xf32>
      tpu.vector_store %arg6[%c0_11, %c0_12], %12 {strides = array<i32>} : memref<64x128xf32, #tpu.memory_space<vmem>>, vector<64x128xf32>,
    } else {
    }
    %c0 = arith.constant 0 : index
    %c0_1 = arith.constant 0 : index
    %3 = vector.load %arg6[%c0, %c0_1] : memref<64x128xf32, #tpu.memory_space<vmem>>, vector<64x128xf32>
    %c0_2 = arith.constant 0 : index
    %c0_3 = arith.constant 0 : index
    %4 = vector.load %arg2[%c0_2, %c0_3] : memref<64x64xbf16, #tpu.memory_space<vmem>>, vector<64x64xbf16>
    %c0_4 = arith.constant 0 : index
    %c0_5 = arith.constant 0 : index
    %5 = vector.load %arg3[%c0_4, %c0_5] : memref<64x128xbf16, #tpu.memory_space<vmem>>, vector<64x128xbf16>
    %cst = arith.constant dense<0.000000e+00> : vector<64x128xf32>
    %6 = tpu.matmul %4, %5, %cst {dimension_numbers = #tpu.dot_dimension_numbers<[1], [0], [0], [1], [0, 0, 1, 1], [], []>} : vector<64x64xbf16>, vector<64x128xbf16>, vector<64x128xf32> -> vector<64x128xf32>
    %7 = arith.addf %3, %6 : vector<64x128xf32>
    %c0_6 = arith.constant 0 : index
    %c0_7 = arith.constant 0 : index
    %8 = vector.load %arg6[%c0_6, %c0_7] : memref<64x128xf32, #tpu.memory_space<vmem>>, vector<64x128xf32>
    tpu.vector_store %arg6[%c0_6, %c0_7], %7 {strides = array<i32>} : memref<64x128xf32, #tpu.memory_space<vmem>>, vector<64x128xf32>,
    %c0_i32_8 = arith.constant 0 : i32
    %9 = arith.cmpi eq, %arg1, %c0_i32_8 : i32
    %10 = arith.extui %9 : i1 to i32
    %c0_i32_9 = arith.constant 0 : i32
    %11 = arith.cmpi ne, %10, %c0_i32_9 : i32
    scf.if %11 {
      %c0_10 = arith.constant 0 : index
      %c0_11 = arith.constant 0 : index
      %12 = vector.load %arg6[%c0_10, %c0_11] : memref<64x128xf32, #tpu.memory_space<vmem>>, vector<64x128xf32>
      %c0_12 = arith.constant 0 : index
      %c0_13 = arith.constant 0 : index
      %13 = vector.load %arg4[%c0_12, %c0_13] : memref<2x128xf32, #tpu.memory_space<vmem>>, vector<1x128xf32>
      %14 = vector.broadcast %13 : vector<1x128xf32> to vector<64x128xf32>
      %15 = arith.addf %12, %14 : vector<64x128xf32>
      %c1 = arith.constant 1 : index
      %c0_14 = arith.constant 0 : index
      %16 = vector.load %arg4[%c1, %c0_14] : memref<2x128xf32, #tpu.memory_space<vmem>>, vector<1x128xf32>
      %cst_15 = arith.constant 0.000000e+00 : f32
      %17 = vector.broadcast %cst_15 : f32 to vector<64x128xf32>
      %18 = arith.cmpf oge, %15, %17 : vector<64x128xf32>
      %19 = vector.broadcast %16 : vector<1x128xf32> to vector<64x128xf32>
      %20 = arith.mulf %19, %15 : vector<64x128xf32>
      %21 = arith.select %18, %15, %20 : vector<64x128xi1>, vector<64x128xf32>
      %22 = arith.truncf %21 : vector<64x128xf32> to vector<64x128xbf16>
      %c0_16 = arith.constant 0 : index
      %c0_17 = arith.constant 0 : index
      %23 = vector.load %arg5[%c0_16, %c0_17] : memref<64x128xbf16, #tpu.memory_space<vmem>>, vector<64x128xbf16>
      tpu.vector_store %arg5[%c0_16, %c0_17], %22 {strides = array<i32>} : memref<64x128xbf16, #tpu.memory_space<vmem>>, vector<64x128xbf16>,
    } else {
    }
    return
  }
  func.func @transform_0(%arg0: i32, %arg1: i32) -> (i32, i32) {
    %c0_i32 = arith.constant 0 : i32
    return %arg0, %arg1 : i32, i32
  }
  func.func @transform_1(%arg0: i32, %arg1: i32) -> (i32, i32) {
    %c0_i32 = arith.constant 0 : i32
    %c0_i32_0 = arith.constant 0 : i32
    return %arg1, %c0_i32 : i32, i32
  }
  func.func @transform_2(%arg0: i32, %arg1: i32) -> (i32, i32) {
    %c0_i32 = arith.constant 0 : i32
    %c0_i32_0 = arith.constant 0 : i32
    %c0_i32_1 = arith.constant 0 : i32
    return %c0_i32, %c0_i32_0 : i32, i32
  }
  func.func @transform_3(%arg0: i32, %arg1: i32) -> (i32, i32) {
    %c0_i32 = arith.constant 0 : i32
    %c0_i32_0 = arith.constant 0 : i32
    return %arg0, %c0_i32 : i32, i32
  }
}

</mosaic_0001>

<bundles_post_ra>
// kernel: tpu_custom_call.1
= control target key start
LH: loop header
LB: loop body
LE: loop exit
PB: predicated region body
PF: predicated region fallthrough
CT: control target
= control target key end

     0   :  { %8 = vsyncpa [#allocation4], 0  ;;  %s518_s0 = inlined_call_operand.hbm [shape: bf16[64,64], index: 0, kind: input, shape index: {}]   ;;  %s519_s1 = inlined_call_operand.hbm [shape: bf16[64,128], index: 1, kind: input, shape index: {}]   ;;  %s520_s2 = inlined_call_operand.hbm [shape: f32[2,128], index: 2, kind: input, shape index: {}]   ;;  %s521_s3 = inlined_call_operand.hbm [shape: bf16[64,128], index: 3, kind: output, shape index: {}]  }
   0x1   :  { %9 = vsyncpa [#allocation7], 0 }
   0x2   :  { %10 = vsyncpa [#allocation5], 0  ;;  %s28_s14 = sshll.u32 %s519_s1, 4  ;;  %s471_s15 = smov [#allocation6]   ;;  %s29_s14 = int_to_ptr.hbm [resolvable:$true] %s28_s14 }
   0x3   :  { %s30_s16 = sshll.u32 %s471_s15, 4  ;;  %s15_s19 = sshll.u32 %s518_s0, 4  ;;  %s31_s16 = int_to_ptr.vmem [resolvable:$true] %s30_s16  ;;  %s16_s19 = int_to_ptr.hbm [resolvable:$true] %s15_s19 }
   0x4   :  { %s472_s20 = smov 64   ;;  %s473_s21 = smov 4  }
   0x5   :  { %36 = dma.hbm_to_vmem [thread:$0]  %s29_s14, 512, %s31_s16, [#allocation7], %s472_s20, %s472_s20, %s473_s21  }
   0x6   :  { %s474_s22 = smov [#allocation3]   ;;  %s42_s1 = sshll.u32 %s520_s2, 4  ;;  %s43_s1 = int_to_ptr.hbm [resolvable:$true] %s42_s1 }
   0x7   :  { %s17_s23 = sshll.u32 %s474_s22, 4  ;;  %s475_s0 = smov [#allocation8]   ;;  %s18_s23 = int_to_ptr.vmem [resolvable:$true] %s17_s23 }
   0x8   :  { %23 = dma.hbm_to_vmem [thread:$0]  %s16_s19, 512, %s18_s23, [#allocation4], %s472_s20, %s472_s20, %s473_s21  }
   0x9   :  { %s44_s26 = sshll.u32 %s475_s0, 4  ;;  %s45_s26 = int_to_ptr.vmem [resolvable:$true] %s44_s26 }
   0xa   :  { %47 = dma.hbm_to_vmem [thread:$0]  %s43_s1, 32, %s45_s26, [#allocation7]  }
   0xb   :  { %465 = dma.done.wait [#allocation4], 512  }
   0xc   :  { %466 = vsyncadd [#allocation4], 4294966784 }
   0xd   :  { %467 = dma.done.wait [#allocation7], 544  }
   0xe   :  { %468 = vsyncadd [#allocation7], 4294966752  ;;  %v325_v0 = vld [vmem:[#allocation6 + $0x18] sm:$0xff]  ;;  %v324_v1 = vld [vmem:[#allocation6 + $0x10] sm:$0xff]  ;;  %vm141_vm0 = vcmask 523264   ;;  %s476_s2 = smov [#allocation9]  }
   0xf   :  { %158 = vmatpush.bf16.msra.mxu0 %v325_v0  ;;  %349 = vmatpush.bf16.msra.mxu1 %v325_v0  ;;  %v323_v2 = vld [vmem:[#allocation6 + $0x8] sm:$0xff]  ;;  %v322_v3 = vld [vmem:[#allocation6] sm:$0xff]  ;;  %v320_v6 = vld [vmem:[#allocation3 + $0x10] sm:$0xff]  ;;  %s266_s27 = sshll.u32 %s476_s2, 4  ;;  %s268_s30 = sshll.u32 %s521_s3, 4  ;;  %s267_s27 = int_to_ptr.vmem [resolvable:$true] %s266_s27  ;;  %s269_s30 = int_to_ptr.hbm [resolvable:$true] %s268_s30 }
  0x10   :  { %350 = vmatpush.bf16.msra.mxu2 %v325_v0  ;;  %351 = vmatpush.bf16.msra.mxu3 %v325_v0  ;;  %v318_v4 = vld [vmem:[#allocation3] sm:$0xff]  ;;  %v319_v5 = vld [vmem:[#allocation3 + $0x8] sm:$0xff]  ;;  %v321_v7 = vld [vmem:[#allocation3 + $0x18] sm:$0xff] }
  0x11   :  { %v367_v10 = vld [vmem:[#allocation8] ss:$0 sm:$0xff]  ;;  %v368_v12 = vld [vmem:[#allocation8 + $0x1] ss:$0 sm:$0xff] }
  0x13   :  { %159 = vmatpush.bf16.msra.mxu0 %v324_v1  ;;  %352 = vmatpush.bf16.msra.mxu1 %v324_v1 }
  0x14   :  { %353 = vmatpush.bf16.msra.mxu2 %v324_v1  ;;  %354 = vmatpush.bf16.msra.mxu3 %v324_v1 }
  0x17   :  { %160 = vmatpush.bf16.msra.mxu0 %v323_v2  ;;  %355 = vmatpush.bf16.msra.mxu1 %v323_v2 }
  0x18   :  { %356 = vmatpush.bf16.msra.mxu2 %v323_v2  ;;  %357 = vmatpush.bf16.msra.mxu3 %v323_v2 }
  0x1b   :  { %161 = vmatpush.bf16.msra.mxu0 %v322_v3  ;;  %358 = vmatpush.bf16.msra.mxu1 %v322_v3 }
  0x1c   :  { %359 = vmatpush.bf16.msra.mxu2 %v322_v3  ;;  %360 = vmatpush.bf16.msra.mxu3 %v322_v3 }
  0x1e   :  { %314 = vmatmul.msk.bf16.vlgmr.msra.gmra.mxu0 %vm141_vm0, %v318_v4  ;;  %315 = vmatmul.msk.bf16.vlgmr.msra.gmra.mxu1 %vm141_vm0, %v319_v5 }
  0x1f   :  { %316 = vmatmul.msk.bf16.vlgmr.msra.gmra.mxu2 %vm141_vm0, %v320_v6  ;;  %317 = vmatmul.msk.bf16.vlgmr.msra.gmra.mxu3 %vm141_vm0, %v321_v7 }
  0x9b   :  { %v163_v8 = vpop.f32.mrf.mxu0  ;;  %v168_v9 = vpop.f32.mrf.mxu1 }
  0x9c   :  { %v212_v11 = vadd.f32 %v367_v10, %v163_v8  ;;  %v214_v13 = vadd.f32 %v367_v10, %v168_v9 }
  0x9e   :  { %v230_v18 = vmul.f32 %v368_v12, %v212_v11  ;;  %v232_v19 = vmul.f32 %v368_v12, %v214_v13  ;;  %vm221_vm1 = vcmp.ge.f32.partialorder %v212_v11, 0.0  ;;  %vm223_vm2 = vcmp.ge.f32.partialorder %v214_v13, 0.0 }
  0xa0   :  { %v238_v26 = vsel %vm221_vm1, %v212_v11, %v230_v18  ;;  %v240_v27 = vsel %vm223_vm2, %v214_v13, %v232_v19 }
  0xa2   :  { %v173_v14 = vpop.f32.mrf.mxu2  ;;  %v178_v15 = vpop.f32.mrf.mxu3 }
  0xa3   :  { %v165_v16 = vpop.f32.mrf.mxu0  ;;  %v170_v17 = vpop.f32.mrf.mxu1  ;;  %v216_v24 = vadd.f32 %v367_v10, %v173_v14  ;;  %v218_v25 = vadd.f32 %v367_v10, %v178_v15 }
  0xa4   :  { %v213_v20 = vadd.f32 %v367_v10, %v165_v16  ;;  %v215_v21 = vadd.f32 %v367_v10, %v170_v17 }
  0xa5   :  { %v234_v34 = vmul.f32 %v368_v12, %v216_v24  ;;  %v236_v35 = vmul.f32 %v368_v12, %v218_v25  ;;  %vm225_vm5 = vcmp.ge.f32.partialorder %v216_v24, 0.0  ;;  %vm227_vm6 = vcmp.ge.f32.partialorder %v218_v25, 0.0 }
  0xa6   :  { %vm222_vm3 = vcmp.ge.f32.partialorder %v213_v20, 0.0  ;;  %v231_v22 = vmul.f32 %v368_v12, %v213_v20  ;;  %vm224_vm4 = vcmp.ge.f32.partialorder %v215_v21, 0.0  ;;  %v233_v23 = vmul.f32 %v368_v12, %v215_v21 }
  0xa7   :  { %v242_v40 = vsel %vm225_vm5, %v216_v24, %v234_v34  ;;  %v244_v41 = vsel %vm227_vm6, %v218_v25, %v236_v35 }
  0xa8   :  { %v239_v28 = vsel %vm222_vm3, %v213_v20, %v231_v22  ;;  %v241_v29 = vsel %vm224_vm4, %v215_v21, %v233_v23 }
  0xa9   :  { %v329_v30 = vpack.c.bf16 %v239_v28, %v238_v26  ;;  %v334_v31 = vpack.c.bf16 %v241_v29, %v240_v27 }
  0xaa   :  { %v175_v32 = vpop.f32.mrf.mxu2  ;;  %v180_v33 = vpop.f32.mrf.mxu3 }
  0xab   :  { %330 = vst [vmem:[#allocation9] sm:$0xff] %v329_v30   ;;  %v217_v36 = vadd.f32 %v367_v10, %v175_v32  ;;  %v219_v37 = vadd.f32 %v367_v10, %v180_v33 }
  0xac   :  { %346 = vst [vmem:[#allocation9 + $0x8] sm:$0xff] %v334_v31  }
  0xad   :  { %vm226_vm7 = vcmp.ge.f32.partialorder %v217_v36, 0.0  ;;  %v235_v38 = vmul.f32 %v368_v12, %v217_v36  ;;  %vm228_vm8 = vcmp.ge.f32.partialorder %v219_v37, 0.0  ;;  %v237_v39 = vmul.f32 %v368_v12, %v219_v37 }
  0xaf   :  { %v243_v42 = vsel %vm226_vm7, %v217_v36, %v235_v38  ;;  %v245_v43 = vsel %vm228_vm8, %v219_v37, %v237_v39 }
  0xb0   :  { %v339_v44 = vpack.c.bf16 %v243_v42, %v242_v40  ;;  %v344_v45 = vpack.c.bf16 %v245_v43, %v244_v41 }
  0xb2   :  { %347 = vst [vmem:[#allocation9 + $0x10] sm:$0xff] %v339_v44  }
  0xb3   :  { %348 = vst [vmem:[#allocation9 + $0x18] sm:$0xff] %v344_v45  }
  0xb4   :  { %274 = dma.vmem_to_hbm [thread:$0]  %s267_s27, 512, %s269_s30, [#allocation5], %s472_s20, %s472_s20, %s473_s21  }
  0xb5   :  { %469 = dma.done.wait [#allocation5], 512  }
  0xb6   :  { %470 = vsyncadd [#allocation5], 4294966784 }
  0xb7   :  { %279 = vsyncpa [#allocation4], 1 }
  0xb8   :  { %280 = vsyncpa [#allocation7], 1 }
  0xb9   :  { %281 = vsyncpa [#allocation5], 1 }

</bundles_post_ra>
